<compile_context>
chip_gen: v6e
topology: v6e:2x2x1
jax: 0.10.0
libtpu: 0.0.40
codegen_flags: <defaults>
</compile_context>

<pallas_src>
import functools

import jax
import jax.numpy as jnp
import numpy as np
from jax.experimental import pallas as pl
from jax.experimental.pallas import tpu as pltpu


# ----------------------------- fused kernel ---------------------------------


def _fused_kernel(a_ref, x_ref, wadj_ref, wg_ref, whe_ref, whd_ref, whn_ref,
                  p_ref, node_ref, edge_ref,
                  *, batch, seq, gcn_dim, edge_dim, dim_e, eps):
    B, S, D, E, F = batch, seq, gcn_dim, edge_dim, dim_e

    # packed bias / LayerNorm slab: rows [b_gcn; a_2; b_2; b_highway(padded)]
    b_gcn = p_ref[0:1, :D]
    a2 = p_ref[1:2, :D]
    b2 = p_ref[2:3, :D]
    bh = p_ref[3:4, :F]

    # -------- node phase: relu(LayerNorm(W @ (mean_e(A_e + L_e) @ X) + b)) --
    # a_ref already holds mean_e(A_e) + mean_e(L_e) (folded in the wrapper).
    ax = jnp.einsum('bij,bjd->bid', a_ref[...], x_ref[...],
                    preferred_element_type=jnp.float32)               # (B, S, D)
    h = jnp.dot(ax.reshape(B * S, D), wg_ref[...],
                preferred_element_type=jnp.float32) + b_gcn           # (B*S, D)

    # torch-style hand-written LayerNorm: unbiased std, eps added to std.
    mean = jnp.mean(h, axis=-1, keepdims=True)
    var = jnp.sum((h - mean) ** 2, axis=-1, keepdims=True) * (1.0 / (D - 1))
    std = jnp.sqrt(var)
    node = jnp.maximum(a2 * (h - mean) / (std + eps) + b2, 0.0)       # (B*S, D)
    node_ref[...] = node.reshape(B, S, D).astype(node_ref.dtype)

    # -------- edge phase (RefiningStrategy highway) --------------------------
    # out[b,i,j] = wadj[b,i,j] @ We
    #            + diag[b,j] @ Wei + node[b,j] @ Wn1 + b_hw     (j-indexed)
    #            + diag[b,i] @ Wej + node[b,i] @ Wn2             (i-indexed)
    # diag[b,k,:] = wadj[b,k,k,:] via strided sublane slices (flat row index
    # b*S*S + k*(S+1)); B is tiny and static, so the Python loop unrolls.
    diag = jnp.concatenate(
        [wadj_ref[pl.ds(b * S * S, S, stride=S + 1), :] for b in range(B)],
        axis=0)                                                        # (B*S, E)

    pr = (jnp.dot(diag, whd_ref[...], preferred_element_type=jnp.float32)
          + jnp.dot(node, whn_ref[...], preferred_element_type=jnp.float32))
    pr = pr.reshape(B, S, 2 * F)
    per_j = pr[:, :, :F] + bh                                          # (B, S, F)
    per_i = pr[:, :, F:]                                               # (B, S, F)

    edge_term = jnp.dot(wadj_ref[...], whe_ref[...],
                        preferred_element_type=jnp.float32)            # (B*S*S, F)
    edge = (edge_term.reshape(B, S, S, F)
            + per_j[:, None, :, :]            # broadcast over i
            + per_i[:, :, None, :])           # broadcast over j
    edge_ref[...] = edge.astype(edge_ref.dtype)


# ----------------------------- one-time parameter prep -----------------------


def prepare_params(w_gcn, b_gcn, a2, b2, w_hw, b_hw):
    """Pure function of the weights; call ONCE at init, not per forward."""
    D = w_gcn.shape[0]
    F, f_in = w_hw.shape
    E = (f_in - 2 * D) // 3

    wh_t = w_hw.T                                        # (3E+2D, F)
    wh_e = wh_t[0:E]                                     # (E, F)    We
    wh_d = jnp.concatenate([wh_t[E:2 * E],               # Wei -> per_j cols
                            wh_t[2 * E:3 * E]], axis=1)  # Wej -> per_i cols
    wh_n = jnp.concatenate([wh_t[3 * E:3 * E + D],       # Wn1 -> per_j cols
                            wh_t[3 * E + D:]], axis=1)   # Wn2 -> per_i cols

    PW = max(D, F)
    pad = lambda v: jnp.pad(v, (0, PW - v.shape[0]))
    p_comb = jnp.stack([pad(b_gcn), pad(a2), pad(b2), pad(b_hw)], axis=0)  # (4, PW)

    return (jnp.asarray(w_gcn.T), wh_e, wh_d, wh_n, p_comb)


# ----------------------------- jitted forward --------------------------------


@jax.jit
def graph_conv_layer(weight_prob_softmax, weight_adj, gcn_inputs, self_loop,
                     params):
    """Mirrors GraphConvLayer.forward (pooling='avg'). Returns (node, edge)."""
    # TODO(synk): only pooling='avg' (the constructor default) is implemented;
    # 'sum' folds the same way, 'max' would need the per-edge-type Ax kept.
    wg_t, wh_e, wh_d, wh_n, p_comb = params
    B, S, D = gcn_inputs.shape
    E = weight_adj.shape[-1]
    F = wh_e.shape[-1]

    # pooling=='avg': mean_e(A_e + L_e) = mean_e(A_e) + mean_e(L_e).  XLA fuses
    # both reductions into one pass; the kernel sees a single dense (B,S,S).
    a_full = jnp.mean(weight_prob_softmax, axis=-1) + jnp.mean(self_loop, axis=1)

    # flat adjacency for the single M=128 edge slab matmul (free reshape).
    wadj_flat = weight_adj.reshape(B * S * S, E)

    node_out, edge_out = pl.pallas_call(
        functools.partial(_fused_kernel, batch=B, seq=S, gcn_dim=D,
                          edge_dim=E, dim_e=F, eps=1e-6),
        out_shape=(jax.ShapeDtypeStruct((B, S, D), gcn_inputs.dtype),
                   jax.ShapeDtypeStruct((B, S, S, F), gcn_inputs.dtype)),
        grid=(1,),                                     # whole batch in one step
        in_specs=[
            pl.BlockSpec((B, S, S), lambda i: (0, 0, 0)),         # mean_e(A)+mean_e(L)
            pl.BlockSpec((B, S, D), lambda i: (0, 0, 0)),         # gcn_inputs
            pl.BlockSpec((B * S * S, E), lambda i: (0, 0)),       # weight_adj (flat)
            pl.BlockSpec((D, D), lambda i: (0, 0)),               # W_gcn.T
            pl.BlockSpec((E, F), lambda i: (0, 0)),               # We.T
            pl.BlockSpec((E, 2 * F), lambda i: (0, 0)),           # [Wei|Wej].T
            pl.BlockSpec((D, 2 * F), lambda i: (0, 0)),           # [Wn1|Wn2].T
            pl.BlockSpec(p_comb.shape, lambda i: (0, 0)),         # biases/LN slab
        ],
        out_specs=[
            pl.BlockSpec((B, S, D), lambda i: (0, 0, 0)),
            pl.BlockSpec((B, S, S, F), lambda i: (0, 0, 0, 0)),
        ],
        compiler_params=pltpu.CompilerParams(
            dimension_semantics=("arbitrary",)),
    )(a_full, gcn_inputs, wadj_flat, wg_t, wh_e, wh_d, wh_n, p_comb)

    return node_out, edge_out


# ----------------------------- reference (pure JAX) ---------------------------


def reference(weight_prob_softmax, weight_adj, gcn_inputs, self_loop,
              w_gcn, b_gcn, a2, b2, w_hw, b_hw, eps=1e-6):
    B, S, D = gcn_inputs.shape
    E = weight_adj.shape[-1]
    wps = jnp.transpose(weight_prob_softmax, (0, 3, 1, 2)) + self_loop   # (B,E,S,S)
    x = jnp.broadcast_to(gcn_inputs[:, None], (B, E, S, D))
    Ax = jnp.einsum('beij,bejd->beid', wps, x).mean(axis=1)              # avg pool
    h = Ax @ w_gcn.T + b_gcn
    mean = h.mean(-1, keepdims=True)
    std = jnp.sqrt(((h - mean) ** 2).sum(-1, keepdims=True) / (D - 1))
    node = jax.nn.relu(a2 * (h - mean) / (std + eps) + b2)
    diag = weight_adj[:, jnp.arange(S), jnp.arange(S), :]                # (B,S,E)
    edge_i = jnp.broadcast_to(diag[:, None, :, :], (B, S, S, E))
    edge_j = jnp.transpose(edge_i, (0, 2, 1, 3))
    n1 = jnp.broadcast_to(node[:, None, :, :], (B, S, S, D))
    n2 = jnp.transpose(n1, (0, 2, 1, 3))
    feat = jnp.concatenate([weight_adj, edge_i, edge_j, n1, n2], axis=-1)
    edge_out = feat @ w_hw.T + b_hw
    return node, edge_out


# ----------------------------- main -------------------------------------------


if __name__ == "__main__":
    B, S, D, E, DIM_E = 2, 8, 32, 4, 8   # batch, seq, gcn_dim, edge_dim, dep_embed_dim

    key = jax.random.PRNGKey(0)
    ks = jax.random.split(key, 8)

    weight_prob_softmax = jax.nn.softmax(
        jax.random.normal(ks[0], (B, S, S, E), dtype=jnp.float32), axis=2)
    weight_adj = jax.random.normal(ks[1], (B, S, S, E), dtype=jnp.float32)
    gcn_inputs = jax.random.normal(ks[2], (B, S, D), dtype=jnp.float32)
    self_loop = jnp.broadcast_to(jnp.eye(S, dtype=jnp.float32), (B, E, S, S))

    # deterministic parameter init (PyTorch Linear-style uniform bounds)
    lim_w = 1.0 / np.sqrt(D)
    w_gcn = jax.random.uniform(ks[3], (D, D), minval=-lim_w, maxval=lim_w,
                               dtype=jnp.float32)
    b_gcn = jax.random.uniform(ks[4], (D,), minval=-lim_w, maxval=lim_w,
                               dtype=jnp.float32)
    a2 = jnp.ones((D,), jnp.float32)     # LayerNorm a_2
    b2 = jnp.zeros((D,), jnp.float32)    # LayerNorm b_2

    f_in = 3 * E + 2 * D
    lim_h = 1.0 / np.sqrt(f_in)
    w_hw = jax.random.uniform(ks[5], (DIM_E, f_in), minval=-lim_h, maxval=lim_h,
                              dtype=jnp.float32)
    b_hw = jax.random.uniform(ks[6], (DIM_E,), minval=-lim_h, maxval=lim_h,
                              dtype=jnp.float32)

    # one-time weight preprocessing (kept OUT of the per-call jit)
    params = jax.block_until_ready(
        prepare_params(w_gcn, b_gcn, a2, b2, w_hw, b_hw))

    node_out, edge_out = graph_conv_layer(
        weight_prob_softmax, weight_adj, gcn_inputs, self_loop, params)
    jax.block_until_ready((node_out, edge_out))

    node_ref, edge_ref = reference(
        weight_prob_softmax, weight_adj, gcn_inputs, self_loop,
        w_gcn, b_gcn, a2, b2, w_hw, b_hw)

    assert node_out.shape == (B, S, D) and edge_out.shape == (B, S, S, DIM_E)
    np.testing.assert_allclose(np.asarray(node_out), np.asarray(node_ref),
                               rtol=1e-3, atol=1e-3)
    np.testing.assert_allclose(np.asarray(edge_out), np.asarray(edge_ref),
                               rtol=1e-3, atol=1e-3)
    print("KERNEL_OK")
</pallas_src>

<mosaic_0001>
module attributes {stable_mosaic.version = 11 : i64} {
  func.func @_fused_kernel(%arg0: i32, %arg1: memref<2x8x8xf32, #tpu.memory_space<vmem>>, %arg2: memref<2x8x32xf32, #tpu.memory_space<vmem>>, %arg3: memref<128x4xf32, #tpu.memory_space<vmem>>, %arg4: memref<32x32xf32, #tpu.memory_space<vmem>>, %arg5: memref<4x8xf32, #tpu.memory_space<vmem>>, %arg6: memref<4x16xf32, #tpu.memory_space<vmem>>, %arg7: memref<32x16xf32, #tpu.memory_space<vmem>>, %arg8: memref<4x32xf32, #tpu.memory_space<vmem>>, %arg9: memref<2x8x32xf32, #tpu.memory_space<vmem>>, %arg10: memref<2x8x8x8xf32, #tpu.memory_space<vmem>>) attributes {dimension_semantics = [#tpu.dimension_semantics<arbitrary>], iteration_bounds = array<i64: 1>, scalar_prefetch = 0 : i64, scratch_operands = 0 : i64, tpu.core_type = #tpu.core_type<tc>, window_params = [{pipeline_mode = #tpu.pipeline_mode<synchronous>, transform_indices = @transform_0, window_bounds = array<i64: 2, 8, 8>}, {pipeline_mode = #tpu.pipeline_mode<synchronous>, transform_indices = @transform_1, window_bounds = array<i64: 2, 8, 32>}, {pipeline_mode = #tpu.pipeline_mode<synchronous>, transform_indices = @transform_2, window_bounds = array<i64: 128, 4>}, {pipeline_mode = #tpu.pipeline_mode<synchronous>, transform_indices = @transform_3, window_bounds = array<i64: 32, 32>}, {pipeline_mode = #tpu.pipeline_mode<synchronous>, transform_indices = @transform_4, window_bounds = array<i64: 4, 8>}, {pipeline_mode = #tpu.pipeline_mode<synchronous>, transform_indices = @transform_5, window_bounds = array<i64: 4, 16>}, {pipeline_mode = #tpu.pipeline_mode<synchronous>, transform_indices = @transform_6, window_bounds = array<i64: 32, 16>}, {pipeline_mode = #tpu.pipeline_mode<synchronous>, transform_indices = @transform_7, window_bounds = array<i64: 4, 32>}, {pipeline_mode = #tpu.pipeline_mode<synchronous>, transform_indices = @transform_8, window_bounds = array<i64: 2, 8, 32>}, {pipeline_mode = #tpu.pipeline_mode<synchronous>, transform_indices = @transform_9, window_bounds = array<i64: 2, 8, 8, 8>}]} {
    %c0 = arith.constant 0 : index
    %c0_0 = arith.constant 0 : index
    %0 = vector.load %arg8[%c0, %c0_0] : memref<4x32xf32, #tpu.memory_space<vmem>>, vector<1x32xf32>
    %c1 = arith.constant 1 : index
    %c0_1 = arith.constant 0 : index
    %1 = vector.load %arg8[%c1, %c0_1] : memref<4x32xf32, #tpu.memory_space<vmem>>, vector<1x32xf32>
    %c2 = arith.constant 2 : index
    %c0_2 = arith.constant 0 : index
    %2 = vector.load %arg8[%c2, %c0_2] : memref<4x32xf32, #tpu.memory_space<vmem>>, vector<1x32xf32>
    %c3 = arith.constant 3 : index
    %c0_3 = arith.constant 0 : index
    %3 = vector.load %arg8[%c3, %c0_3] : memref<4x32xf32, #tpu.memory_space<vmem>>, vector<1x8xf32>
    %c0_4 = arith.constant 0 : index
    %c0_5 = arith.constant 0 : index
    %c0_6 = arith.constant 0 : index
    %4 = vector.load %arg1[%c0_4, %c0_5, %c0_6] : memref<2x8x8xf32, #tpu.memory_space<vmem>>, vector<2x8x8xf32>
    %c0_7 = arith.constant 0 : index
    %c0_8 = arith.constant 0 : index
    %c0_9 = arith.constant 0 : index
    %5 = vector.load %arg2[%c0_7, %c0_8, %c0_9] : memref<2x8x32xf32, #tpu.memory_space<vmem>>, vector<2x8x32xf32>
    "tpu.trace_start"() <{level = 10 : i32, message = "bij,bjd->bid"}> : () -> ()
    %cst = arith.constant dense<0.000000e+00> : vector<2x8x32xf32>
    %6 = tpu.matmul %4, %5, %cst {dimension_numbers = #tpu.dot_dimension_numbers<[2], [1], [1], [2], [0, 0, 0, 1, 1, 2], [0], [0]>} : vector<2x8x8xf32>, vector<2x8x32xf32>, vector<2x8x32xf32> -> vector<2x8x32xf32>
    "tpu.trace_stop"() : () -> ()
    %7 = vector.shape_cast %6 : vector<2x8x32xf32> to vector<16x32xf32>
    %c0_10 = arith.constant 0 : index
    %c0_11 = arith.constant 0 : index
    %8 = vector.load %arg4[%c0_10, %c0_11] : memref<32x32xf32, #tpu.memory_space<vmem>>, vector<32x32xf32>
    %cst_12 = arith.constant dense<0.000000e+00> : vector<16x32xf32>
    %9 = tpu.matmul %7, %8, %cst_12 {dimension_numbers = #tpu.dot_dimension_numbers<[1], [0], [0], [1], [0, 0, 1, 1], [], []>} : vector<16x32xf32>, vector<32x32xf32>, vector<16x32xf32> -> vector<16x32xf32>
    %10 = vector.broadcast %0 : vector<1x32xf32> to vector<16x32xf32>
    %11 = arith.addf %9, %10 : vector<16x32xf32>
    %cst_13 = arith.constant dense<0.000000e+00> : vector<16xf32>
    %12 = vector.multi_reduction <add>, %11, %cst_13 [1] : vector<16x32xf32> to vector<16xf32>
    %13 = vector.shape_cast %12 : vector<16xf32> to vector<16x1xf32>
    %cst_14 = arith.constant 3.200000e+01 : f32
    %14 = vector.broadcast %cst_14 : f32 to vector<16x1xf32>
    %15 = arith.divf %13, %14 : vector<16x1xf32>
    %16 = vector.broadcast %15 : vector<16x1xf32> to vector<16x32xf32>
    %17 = arith.subf %11, %16 : vector<16x32xf32>
    %18 = arith.mulf %17, %17 : vector<16x32xf32>
    %cst_15 = arith.constant dense<0.000000e+00> : vector<16xf32>
    %19 = vector.multi_reduction <add>, %18, %cst_15 [1] : vector<16x32xf32> to vector<16xf32>
    %20 = vector.shape_cast %19 : vector<16xf32> to vector<16x1xf32>
    %cst_16 = arith.constant 0.0322580636 : f32
    %21 = vector.broadcast %cst_16 : f32 to vector<16x1xf32>
    %22 = arith.mulf %20, %21 : vector<16x1xf32>
    %23 = math.sqrt %22 : vector<16x1xf32>
    %24 = vector.broadcast %15 : vector<16x1xf32> to vector<16x32xf32>
    %25 = arith.subf %11, %24 : vector<16x32xf32>
    %26 = vector.broadcast %1 : vector<1x32xf32> to vector<16x32xf32>
    %27 = arith.mulf %26, %25 : vector<16x32xf32>
    %cst_17 = arith.constant 9.99999997E-7 : f32
    %28 = vector.broadcast %cst_17 : f32 to vector<16x1xf32>
    %29 = arith.addf %23, %28 : vector<16x1xf32>
    %30 = vector.broadcast %29 : vector<16x1xf32> to vector<16x32xf32>
    %31 = arith.divf %27, %30 : vector<16x32xf32>
    %32 = vector.broadcast %2 : vector<1x32xf32> to vector<16x32xf32>
    %33 = arith.addf %31, %32 : vector<16x32xf32>
    %cst_18 = arith.constant 0.000000e+00 : f32
    %34 = vector.broadcast %cst_18 : f32 to vector<16x32xf32>
    %35 = arith.maximumf %33, %34 : vector<16x32xf32>
    %36 = vector.shape_cast %35 : vector<16x32xf32> to vector<2x8x32xf32>
    %c0_19 = arith.constant 0 : index
    %c0_20 = arith.constant 0 : index
    %c0_21 = arith.constant 0 : index
    %37 = vector.load %arg9[%c0_19, %c0_20, %c0_21] : memref<2x8x32xf32, #tpu.memory_space<vmem>>, vector<2x8x32xf32>
    tpu.vector_store %arg9[%c0_19, %c0_20, %c0_21], %36 {strides = array<i32>} : memref<2x8x32xf32, #tpu.memory_space<vmem>>, vector<2x8x32xf32>,
    %c0_22 = arith.constant 0 : index
    %c0_23 = arith.constant 0 : index
    %38 = tpu.strided_load %arg3[%c0_22, %c0_23] {strides = array<i32: 9, 1>} : memref<128x4xf32, #tpu.memory_space<vmem>>, vector<8x4xf32>
    %c64 = arith.constant 64 : index
    %c0_24 = arith.constant 0 : index
    %39 = tpu.strided_load %arg3[%c64, %c0_24] {strides = array<i32: 9, 1>} : memref<128x4xf32, #tpu.memory_space<vmem>>, vector<8x4xf32>
    %40 = tpu.concatenate %38, %39 in 0 : vector<8x4xf32>, vector<8x4xf32> -> vector<16x4xf32>
    %c0_25 = arith.constant 0 : index
    %c0_26 = arith.constant 0 : index
    %41 = vector.load %arg6[%c0_25, %c0_26] : memref<4x16xf32, #tpu.memory_space<vmem>>, vector<4x16xf32>
    %cst_27 = arith.constant dense<0.000000e+00> : vector<16x16xf32>
    %42 = tpu.matmul %40, %41, %cst_27 {dimension_numbers = #tpu.dot_dimension_numbers<[1], [0], [0], [1], [0, 0, 1, 1], [], []>} : vector<16x4xf32>, vector<4x16xf32>, vector<16x16xf32> -> vector<16x16xf32>
    %c0_28 = arith.constant 0 : index
    %c0_29 = arith.constant 0 : index
    %43 = vector.load %arg7[%c0_28, %c0_29] : memref<32x16xf32, #tpu.memory_space<vmem>>, vector<32x16xf32>
    %cst_30 = arith.constant dense<0.000000e+00> : vector<16x16xf32>
    %44 = tpu.matmul %35, %43, %cst_30 {dimension_numbers = #tpu.dot_dimension_numbers<[1], [0], [0], [1], [0, 0, 1, 1], [], []>} : vector<16x32xf32>, vector<32x16xf32>, vector<16x16xf32> -> vector<16x16xf32>
    %45 = arith.addf %42, %44 : vector<16x16xf32>
    %46 = vector.shape_cast %45 : vector<16x16xf32> to vector<2x8x16xf32>
    %47 = vector.extract_strided_slice %46 {offsets = [0, 0, 0], sizes = [2, 8, 8], strides = [1, 1, 1]} : vector<2x8x16xf32> to vector<2x8x8xf32>
    %48 = vector.shape_cast %3 : vector<1x8xf32> to vector<1x1x8xf32>
    %49 = vector.broadcast %48 : vector<1x1x8xf32> to vector<2x8x8xf32>
    %50 = arith.addf %47, %49 : vector<2x8x8xf32>
    %51 = vector.extract_strided_slice %46 {offsets = [0, 0, 8], sizes = [2, 8, 8], strides = [1, 1, 1]} : vector<2x8x16xf32> to vector<2x8x8xf32>
    %c0_31 = arith.constant 0 : index
    %c0_32 = arith.constant 0 : index
    %52 = vector.load %arg3[%c0_31, %c0_32] : memref<128x4xf32, #tpu.memory_space<vmem>>, vector<128x4xf32>
    %c0_33 = arith.constant 0 : index
    %c0_34 = arith.constant 0 : index
    %53 = vector.load %arg5[%c0_33, %c0_34] : memref<4x8xf32, #tpu.memory_space<vmem>>, vector<4x8xf32>
    %cst_35 = arith.constant dense<0.000000e+00> : vector<128x8xf32>
    %54 = tpu.matmul %52, %53, %cst_35 {dimension_numbers = #tpu.dot_dimension_numbers<[1], [0], [0], [1], [0, 0, 1, 1], [], []>} : vector<128x4xf32>, vector<4x8xf32>, vector<128x8xf32> -> vector<128x8xf32>
    %55 = vector.shape_cast %54 : vector<128x8xf32> to vector<2x8x8x8xf32>
    %56 = vector.shape_cast %50 : vector<2x8x8xf32> to vector<2x1x8x8xf32>
    %57 = vector.broadcast %56 : vector<2x1x8x8xf32> to vector<2x8x8x8xf32>
    %58 = arith.addf %55, %57 : vector<2x8x8x8xf32>
    %59 = vector.shape_cast %51 : vector<2x8x8xf32> to vector<2x8x1x8xf32>
    %60 = vector.broadcast %59 : vector<2x8x1x8xf32> to vector<2x8x8x8xf32>
    %61 = arith.addf %58, %60 : vector<2x8x8x8xf32>
    %c0_36 = arith.constant 0 : index
    %c0_37 = arith.constant 0 : index
    %c0_38 = arith.constant 0 : index
    %c0_39 = arith.constant 0 : index
    %62 = vector.load %arg10[%c0_36, %c0_37, %c0_38, %c0_39] : memref<2x8x8x8xf32, #tpu.memory_space<vmem>>, vector<2x8x8x8xf32>
    tpu.vector_store %arg10[%c0_36, %c0_37, %c0_38, %c0_39], %61 {strides = array<i32>} : memref<2x8x8x8xf32, #tpu.memory_space<vmem>>, vector<2x8x8x8xf32>,
    return
  }
  func.func @transform_0(%arg0: i32) -> (i32, i32, i32) {
    %c0_i32 = arith.constant 0 : i32
    %c0_i32_0 = arith.constant 0 : i32
    %c0_i32_1 = arith.constant 0 : i32
    %c0_i32_2 = arith.constant 0 : i32
    return %c0_i32, %c0_i32_0, %c0_i32_1 : i32, i32, i32
  }
  func.func @transform_1(%arg0: i32) -> (i32, i32, i32) {
    %c0_i32 = arith.constant 0 : i32
    %c0_i32_0 = arith.constant 0 : i32
    %c0_i32_1 = arith.constant 0 : i32
    %c0_i32_2 = arith.constant 0 : i32
    return %c0_i32, %c0_i32_0, %c0_i32_1 : i32, i32, i32
  }
  func.func @transform_2(%arg0: i32) -> (i32, i32) {
    %c0_i32 = arith.constant 0 : i32
    %c0_i32_0 = arith.constant 0 : i32
    %c0_i32_1 = arith.constant 0 : i32
    return %c0_i32, %c0_i32_0 : i32, i32
  }
  func.func @transform_3(%arg0: i32) -> (i32, i32) {
    %c0_i32 = arith.constant 0 : i32
    %c0_i32_0 = arith.constant 0 : i32
    %c0_i32_1 = arith.constant 0 : i32
    return %c0_i32, %c0_i32_0 : i32, i32
  }
  func.func @transform_4(%arg0: i32) -> (i32, i32) {
    %c0_i32 = arith.constant 0 : i32
    %c0_i32_0 = arith.constant 0 : i32
    %c0_i32_1 = arith.constant 0 : i32
    return %c0_i32, %c0_i32_0 : i32, i32
  }
  func.func @transform_5(%arg0: i32) -> (i32, i32) {
    %c0_i32 = arith.constant 0 : i32
    %c0_i32_0 = arith.constant 0 : i32
    %c0_i32_1 = arith.constant 0 : i32
    return %c0_i32, %c0_i32_0 : i32, i32
  }
  func.func @transform_6(%arg0: i32) -> (i32, i32) {
    %c0_i32 = arith.constant 0 : i32
    %c0_i32_0 = arith.constant 0 : i32
    %c0_i32_1 = arith.constant 0 : i32
    return %c0_i32, %c0_i32_0 : i32, i32
  }
  func.func @transform_7(%arg0: i32) -> (i32, i32) {
    %c0_i32 = arith.constant 0 : i32
    %c0_i32_0 = arith.constant 0 : i32
    %c0_i32_1 = arith.constant 0 : i32
    return %c0_i32, %c0_i32_0 : i32, i32
  }
  func.func @transform_8(%arg0: i32) -> (i32, i32, i32) {
    %c0_i32 = arith.constant 0 : i32
    %c0_i32_0 = arith.constant 0 : i32
    %c0_i32_1 = arith.constant 0 : i32
    %c0_i32_2 = arith.constant 0 : i32
    return %c0_i32, %c0_i32_0, %c0_i32_1 : i32, i32, i32
  }
  func.func @transform_9(%arg0: i32) -> (i32, i32, i32, i32) {
    %c0_i32 = arith.constant 0 : i32
    %c0_i32_0 = arith.constant 0 : i32
    %c0_i32_1 = arith.constant 0 : i32
    %c0_i32_2 = arith.constant 0 : i32
    %c0_i32_3 = arith.constant 0 : i32
    return %c0_i32, %c0_i32_0, %c0_i32_1, %c0_i32_2 : i32, i32, i32, i32
  }
}

</mosaic_0001>

<bundles_post_ra>
// kernel: graph_conv_layer.1
= control target key start
LH: loop header
LB: loop body
LE: loop exit
PB: predicated region body
PF: predicated region fallthrough
CT: control target
= control target key end

     0   :  { %15 = vsyncpa [#allocation3], 0  ;;  %v1213_v2 = vmov 0.0   ;;  %vm41_vm0 = vcmask 64512   ;;  %vm1214_vm1 = vmmov 0   ;;  %s1528_s0 = inlined_call_operand.vmem [shape: f32[2,8,8], index: 0, kind: input, shape index: {}]   ;;  %s1529_s1 = inlined_call_operand.vmem [shape: f32[2,8,32], index: 1, kind: input, shape index: {}]   ;;  %s1530_s2 = inlined_call_operand.vmem [shape: f32[128,4], index: 2, kind: input, shape index: {}]   ;;  %s1531_s3 = inlined_call_operand.vmem [shape: f32[32,32], index: 3, kind: input, shape index: {}]   ;;  %s1532_s4 = inlined_call_operand.vmem [shape: f32[4,8], index: 4, kind: input, shape index: {}]   ;;  %s1533_s5 = inlined_call_operand.vmem [shape: f32[4,16], index: 5, kind: input, shape index: {}]   ;;  %s1534_s6 = inlined_call_operand.vmem [shape: f32[32,16], index: 6, kind: input, shape index: {}]   ;;  %s1535_s7 = inlined_call_operand.vmem [shape: f32[4,32], index: 7, kind: input, shape index: {}]   ;;  %s1536_s8 = inlined_call_operand.hbm [shape: f32[2,8,32], index: 8, kind: output, shape index: {0}]   ;;  %s1537_s9 = inlined_call_operand.hbm [shape: f32[2,8,8,8], index: 9, kind: output, shape index: {1}]  }
   0x1   :  { %v39_v0 = vld [vmem:[%s1529_s1] sm:$0xff]  ;;  %v40_v1 = vld [vmem:[%s1529_s1 + $0x8] sm:$0xff]  ;;  %1088 = vmatprep.subr.mxu0 %v1213_v2  ;;  %1093 = vmatprep.subr.mxu1 %v1213_v2  ;;  %v191_v5 = vld [vmem:[%s1531_s3 + $0x18] sm:$0xff] }
   0x2   :  { %v37_v3 = vld [vmem:[%s1528_s0] sm:$0xff]  ;;  %v38_v4 = vld [vmem:[%s1528_s0 + $0x8] sm:$0xff]  ;;  %1089 = vmatpush3.msra.mxu0 %v39_v0  ;;  %1090 = vmatprep.mubr.msk.f32.mxu0 %vm1214_vm1, %v1213_v2 }
   0x3   :  { %16 = vsyncpa [#allocation5], 0  ;;  %1094 = vmatpush3.msra.mxu1 %v40_v1  ;;  %1095 = vmatprep.mubr.msk.f32.mxu1 %vm1214_vm1, %v1213_v2  ;;  %v190_v6 = vld [vmem:[%s1531_s3 + $0x10] sm:$0xff]  ;;  %v189_v7 = vld [vmem:[%s1531_s3 + $0x8] sm:$0xff]  ;;  %vm196_vm2 = vcmask 261120   ;;  %vm431_vm3 = vcmask 1043456  }
   0x4   :  { %1091 = vmatmul.mubr.msk.f32.vlgmr.msra.gmra.mxu0 %vm41_vm0, %v37_v3  ;;  %1096 = vmatmul.mubr.msk.f32.vlgmr.msra.gmra.mxu1 %vm41_vm0, %v38_v4  ;;  %v188_v8 = vld [vmem:[%s1531_s3] sm:$0xff]  ;;  %vm424_vm4 = vcmask 31744   ;;  %v342_v32 = vld [vmem:[%s1534_s6 + $0x18] sm:$0xff]  ;;  %v341_v34 = vld [vmem:[%s1534_s6 + $0x10] sm:$0xff]  ;;  %s1217_s24 = smov [#allocation2]  }
   0x5   :  { %1098 = vmatprep.subr.mxu0 %v191_v5  ;;  %v1023_v14 = vld [vmem:[%s1535_s7] ss:$0 sm:$0xff]  ;;  %1109 = vmatprep.subr.mxu1 %v342_v32  ;;  %v340_v37 = vld [vmem:[%s1534_s6 + $0x8] sm:$0xff]  ;;  %v518_v40 = vld [vmem:[%s1530_s2 + $0x10] sm:$0xff] }
   0x6   :  { %1099 = vmatpush3.msra.mxu0 %v191_v5  ;;  %v338_v30 = vld [vmem:[%s1533_s5] sm:$0xf]  ;;  %1110 = vmatpush3.msra.mxu1 %v342_v32  ;;  %v517_v38 = vld [vmem:[%s1530_s2 + $0x8] sm:$0xff]  ;;  %v519_v41 = vld [vmem:[%s1530_s2 + $0x18] sm:$0xff] }
   0x7   :  { %1100 = vmatprep.subr.mxu0 %v190_v6  ;;  %v335_v31 = vld [vmem:[%s1530_s2] ss:$9 sm:$0xff]  ;;  %1111 = vmatprep.subr.mxu1 %v341_v34  ;;  %v1026_v60 = vld [vmem:[%s1535_s7 + $0x1] ss:$0 sm:$0xff]  ;;  %v1027_v63 = vld [vmem:[%s1535_s7 + $0x2] ss:$0 sm:$0xff] }
   0x8   :  { %1101 = vmatpush3.msra.mxu0 %v190_v6  ;;  %v1028_v33 = vld [vmem:[%s1530_s2 + $0x40] ss:$9 sm:$0xff]  ;;  %1112 = vmatpush3.msra.mxu1 %v341_v34 }
   0x9   :  { %1102 = vmatprep.subr.mxu0 %v189_v7  ;;  %v1335_v35 = vld [vmem:[%s1532_s4] sm:$0xf]  ;;  %1113 = vmatprep.subr.mxu1 %v340_v37  ;;  %v521_v43 = vld [vmem:[%s1530_s2 + $0x28] sm:$0xff] }
   0xa   :  { %1103 = vmatpush3.msra.mxu0 %v189_v7  ;;  %v516_v36 = vld [vmem:[%s1530_s2] sm:$0xff]  ;;  %1114 = vmatpush3.msra.mxu1 %v340_v37 }
   0xb   :  { %1104 = vmatprep.subr.mxu0 %v188_v8  ;;  %v339_v39 = vld [vmem:[%s1534_s6] sm:$0xff]  ;;  %s994_s6 = sshll.u32 %s1217_s24, 4  ;;  %s995_s6 = int_to_ptr.vmem [resolvable:$true] %s994_s6 }
   0xc   :  { %1105 = vmatpush3.msra.mxu0 %v188_v8  ;;  %1115 = vmatprep.subr.mxu1 %v339_v39  ;;  %v520_v42 = vld [vmem:[%s1530_s2 + $0x20] sm:$0xff]  ;;  %v522_v8 = vld [vmem:[%s1530_s2 + $0x30] sm:$0xff]  ;;  %s1169_s3 = scalar_lea.vmem %s995_s6, 256  ;;  %p1174_p1 = scmp.lt.s32.totalorder %s995_s6, %s995_s6 }
   0xd   :  { %1120 = vmatprep.subr.msk.mxu0 %vm431_vm3, %v338_v30  ;;  %1116 = vmatpush3.msra.mxu1 %v339_v39  ;;  %p1170_p0 = scmp.ne.s32.totalorder %s995_s6, %s1169_s3  ;;  %p1175_p2 = scmp.lt.s32.totalorder %s1169_s3, %s1169_s3 }
   0xe   :  { %1151 = vmatprep.subr.msk.mxu1 %vm431_vm3, %v1335_v35 }
   0xf   :  { %p1176_p3 = por %p1175_p2, %p1174_p1 }
  0x11   :  { %p1177_p4 = pnand %p1176_p3, %p1170_p0 }
  0xc4   :  { %v111_v9 = vpop.f32.mrf.mxu0  ;;  %v184_v10 = vpop.f32.mrf.mxu1 }
  0xc5   :  { %1106 = vmatprep.mubr.msk.f32.mxu0 %vm196_vm2, %v111_v9  ;;  %v523_v9 = vld [vmem:[%s1530_s2 + $0x38] sm:$0xff] }
  0xc6   :  { %v1092_v11 = vpop.f32.mrf.mxu0  ;;  %v1097_v12 = vpop.f32.mrf.mxu1  ;;  %1107 = vmatmul.mubr.msk.f32.vlgmr.msra.gmra.mxu0 %vm196_vm2, %v184_v10  ;;  %v524_v10 = vld [vmem:[%s1530_s2 + $0x40] sm:$0xff] }
  0xc7   :  { %1122 = vmatprep.mubr.msk.f32.mxu0 %vm424_vm4, %v335_v31  ;;  %1121 = vmatpush3.msk.msra.mxu0 %vm431_vm3, %v338_v30  ;;  %v525_v11 = vld [vmem:[%s1530_s2 + $0x48] sm:$0xff]  ;;  %v526_v12 = vld [vmem:[%s1530_s2 + $0x50] sm:$0xff] }
  0xc8   :  { %1125 = vmatprep.subr.msk.mxu0 %vm431_vm3, %v1335_v35 }
  0xca   :  { %1123 = vmatmul.mubr.msk.f32.vlgmr.msra.gmra.mxu0 %vm424_vm4, %v1028_v33 }
  0xcb   :  { %1126 = vmatpush3.msk.msra.mxu0 %vm431_vm3, %v1335_v35  ;;  %1127 = vmatprep.mubr.msk.f32.mxu0 %vm424_vm4, %v516_v36 }
  0xce   :  { %1128 = vmatmul.mubr.msk.f32.vlgmr.msra.gmra.mxu0 %vm424_vm4, %v517_v38 }
  0xcf   :  { %1130 = vmatprep.mubr.msk.f32.mxu0 %vm424_vm4, %v518_v40 }
  0xd2   :  { %1131 = vmatmul.mubr.msk.f32.gmra.mxu0 %vm424_vm4, %v519_v41 }
  0xd3   :  { %1133 = vmatprep.mubr.msk.f32.mxu0 %vm424_vm4, %v520_v42 }
  0xd6   :  { %1134 = vmatmul.mubr.msk.f32.gmra.mxu0 %vm424_vm4, %v521_v43 }
 0x186   :  { %v1108_v13 = vpop.f32.mrf.mxu0 }
 0x187   :  { %v275_v17 = vadd.f32 %v1108_v13, %v1023_v14  ;;  %v527_v13 = vld [vmem:[%s1530_s2 + $0x58] sm:$0xff] }
 0x188   :  { %v269_v15 = vpop.f32.mrf.mxu0 }
 0x189   :  { %v270_v16 = vadd.f32 %v1023_v14, %v269_v15  ;;  %v281_v19 = vsel %vm196_vm2, %v275_v17, 0.0  ;;  %v528_v14 = vld [vmem:[%s1530_s2 + $0x60] sm:$0xff]  ;;  %v529_v15 = vld [vmem:[%s1530_s2 + $0x68] sm:$0xff] }
 0x18b   :  { %v278_v18 = vsel %vm196_vm2, %v270_v16, 0.0 }
 0x18c   :  { %279 = vadd.xlane.f32.xlu0 %v278_v18  ;;  %v1215_v18 = vmov 1966171168  }
 0x190   :  { %282 = vadd.xlane.f32.xlu0 %v281_v19  ;;  %v749_v19 = vunpack.c.l.s4 %v1215_v18 }
 0x215   :  { %v280_v20 = vpop.xlane.xlu0 %279 }
 0x216   :  { %v285_v21 = vmul.f32 0.03125, %v280_v20  ;;  %v751_v20 = vlaneseq }
 0x218   :  { %v1304_v22 = vsub.f32 %v270_v16, %v285_v21  ;;  %v530_v16 = vld [vmem:[%s1530_s2 + $0x70] sm:$0xff]  ;;  %v750_v21 = vunpack.c.0.s8 %v749_v19 }
 0x219   :  { %v283_v23 = vpop.xlane.xlu0 %282 }
 0x21a   :  { %v286_v24 = vmul.f32 0.03125, %v283_v23  ;;  %v289_v25 = vmul.f32 %v1304_v22, %v1304_v22  ;;  %v317_v61 = vmul.f32 %v1026_v60, %v1304_v22  ;;  %v752_v22 = vshrl.u32 %v751_v20, 7  ;;  %v1124_v23 = vpop.f32.mrf.mxu0 }
 0x21c   :  { %v1308_v26 = vsub.f32 %v275_v17, %v286_v24  ;;  %v291_v27 = vsel %vm196_vm2, %v289_v25, 0.0  ;;  %v531_v17 = vld [vmem:[%s1530_s2 + $0x78] sm:$0xff]  ;;  %v753_v24 = vsub.s32 %v750_v21, %v752_v22  ;;  %v1433_v31 = vsub.s32 0, %v752_v22  ;;  %s1216_s2 = smov 120  }
 0x21d   :  { %292 = vadd.xlane.f32.xlu1 %v291_v27  ;;  %v501_v27 = vpop.f32.mrf.mxu0 }
 0x21e   :  { %v290_v28 = vmul.f32 %v1308_v26, %v1308_v26  ;;  %v318_v1 = vmul.f32 %v1026_v60, %v1308_v26 }
 0x220   :  { %v294_v29 = vsel %vm196_vm2, %v290_v28, 0.0 }
 0x221   :  { %295 = vadd.xlane.f32.xlu1 %v294_v29 }
 0x2a6   :  { %v293_v44 = vpop.xlane.xlu1 %292 }
 0x2a7   :  { %v297_v45 = vmul.f32 0.032258064, %v293_v44 }
 0x2a9   :  { %1161 = vrsqrt.f32 %v297_v45  ;;  %vm301_vm5 = vcmp.eq.f32.partialorder %v297_v45, inf  ;;  %v304_v50 = vand.u32 2147483648, %v297_v45  ;;  %vm303_vm6 = vcmp.eq.f32.partialorder %v297_v45, 0.0 }
 0x2aa   :  { %v296_v46 = vpop.xlane.xlu1 %295 }
 0x2ab   :  { %v298_v47 = vmul.f32 0.032258064, %v296_v46 }
 0x2ad   :  { %1163 = vrsqrt.f32 %v298_v47  ;;  %vm308_vm7 = vcmp.eq.f32.partialorder %v298_v47, inf  ;;  %v311_v56 = vand.u32 2147483648, %v298_v47  ;;  %vm310_vm8 = vcmp.eq.f32.partialorder %v298_v47, 0.0 }
 0x2b6   :  { %v1162_v48 = vpop.eup %1161 }
 0x2b7   :  { %v300_v49 = vmul.f32 %v1162_v48, %v297_v45 }
 0x2b9   :  { %v302_v51 = vsel %vm301_vm5, %v297_v45, %v300_v49 }
 0x2ba   :  { %v1164_v52 = vpop.eup %1163  ;;  %v305_v53 = vsel %vm303_vm6, %v304_v50, %v302_v51 }
 0x2bb   :  { %v319_v54 = vadd.f32 1e-06, %v305_v53  ;;  %v307_v55 = vmul.f32 %v1164_v52, %v298_v47 }
 0x2bd   :  { %1165 = vrcp.f32 %v319_v54  ;;  %v309_v57 = vsel %vm308_vm7, %v298_v47, %v307_v55 }
 0x2be   :  { %v312_v58 = vsel %vm310_vm8, %v311_v56, %v309_v57 }
 0x2bf   :  { %v320_v59 = vadd.f32 1e-06, %v312_v58 }
 0x2c1   :  { %1167 = vrcp.f32 %v320_v59 }
 0x2ca   :  { %v1166_v62 = vpop.eup %1165 }
 0x2cb   :  { %v322_v0 = vmul.f32 %v1166_v62, %v317_v61 }
 0x2cd   :  { %v329_v2 = vadd.f32 %v1027_v63, %v322_v0 }
 0x2ce   :  { %v1168_v3 = vpop.eup %1167 }
 0x2cf   :  { %v324_v4 = vmul.f32 %v1168_v3, %v318_v1  ;;  %v331_v5 = vmax.f32 %v329_v2, 0.0 }
 0x2d1   :  { %v330_v6 = vadd.f32 %v1027_v63, %v324_v4  ;;  %1117 = vmatprep.mubr.msk.f32.mxu1 %vm196_vm2, %v331_v5  ;;  %333 = vst.msk [vmem:[#allocation2] sm:$0xff] %vm196_vm2, %v331_v5 }
 0x2d3   :  { %v332_v7 = vmax.f32 %v330_v6, 0.0 }
 0x2d5   :  { %334 = vst.msk [vmem:[#allocation2 + $0x8] sm:$0xff] %vm196_vm2, %v332_v7  ;;  %1118 = vmatmul.mubr.msk.f32.vlgmr.msra.gmra.mxu1 %vm196_vm2, %v332_v7 }
 0x2d6   :  { %1152 = vmatpush3.msk.msra.mxu1 %vm431_vm3, %v1335_v35  ;;  %1136 = vmatprep.mubr.msk.f32.mxu1 %vm424_vm4, %v522_v8 }
 0x2d9   :  { %1137 = vmatmul.mubr.msk.f32.vlgmr.msra.gmra.mxu1 %vm424_vm4, %v523_v9 }
 0x2da   :  { %1139 = vmatprep.mubr.msk.f32.mxu1 %vm424_vm4, %v524_v10 }
 0x2dd   :  { %1140 = vmatmul.mubr.msk.f32.gmra.mxu1 %vm424_vm4, %v525_v11 }
 0x2de   :  { %1142 = vmatprep.mubr.msk.f32.mxu1 %vm424_vm4, %v526_v12 }
 0x2e1   :  { %1143 = vmatmul.mubr.msk.f32.gmra.mxu1 %vm424_vm4, %v527_v13 }
 0x2e2   :  { %1145 = vmatprep.mubr.msk.f32.mxu1 %vm424_vm4, %v528_v14 }
 0x2e5   :  { %1146 = vmatmul.mubr.msk.f32.gmra.mxu1 %vm424_vm4, %v529_v15 }
 0x2e6   :  { %1148 = vmatprep.mubr.msk.f32.mxu1 %vm424_vm4, %v530_v16 }
 0x2e9   :  { %1149 = vmatmul.mubr.msk.f32.gmra.mxu1 %vm424_vm4, %v531_v17 }
 0x395   :  { %v1119_v25 = vpop.f32.mrf.mxu1 }
 0x396   :  { %v1428_v26 = vadd.f32 %v1124_v23, %v1119_v25 }
 0x397   :  { %v415_v28 = vpop.f32.mrf.mxu1 }
 0x398   :  { %v803_v29 = vrot.slane %v1428_v26, %v753_v24  ;;  %v1431_v30 = vadd.f32 %v501_v27, %v415_v28  ;;  %v796_v35 = vcombine.high %v1428_v26, %v1428_v26 }
 0x39a   :  { %v811_v32 = vcombine.high %v803_v29, %v803_v29  ;;  %v754_v33 = vrot.slane %v1431_v30, %v753_v24  ;;  %v819_v34 = vrot.slane %v803_v29, %v753_v24  ;;  %v810_v42 = vrot.slane %v796_v35, %v753_v24 }
 0x39b   :  { %v747_v43 = vcombine.high %v1431_v30, %v1431_v30 }
 0x39c   :  { %v762_v36 = vcombine.high %v754_v33, %v754_v33  ;;  %v880_v37 = vrot.slane %v819_v34, %v1433_v31  ;;  %v833_v38 = vrot.slane %v811_v32, %v753_v24  ;;  %v770_v39 = vrot.slane %v754_v33, %v753_v24 }
 0x39d   :  { %v841_v45 = vcombine.high %v819_v34, %v819_v34  ;;  %v761_v48 = vrot.slane %v747_v43, %v753_v24  ;;  %v826_v50 = vrot.slane %v810_v42, %v753_v24  ;;  %v812_v53 = vcombine.high %v810_v42, %v810_v42 }
 0x39e   :  { %925 = vrot.lane.b32.xlu0 %v880_v37, %s1216_s2  ;;  %v884_v40 = vrot.slane %v833_v38, %v1433_v31  ;;  %v784_v41 = vrot.slane %v762_v36, %v753_v24  ;;  %v848_v44 = vrot.slane %v770_v39, %v1433_v31  ;;  %v792_v47 = vcombine.high %v770_v39, %v770_v39 }
 0x39f   :  { %v888_v49 = vrot.slane %v841_v45, %v1433_v31  ;;  %v843_v52 = vcombine.high %v833_v38, %v833_v38  ;;  %v896_v54 = vrot.slane %v826_v50, %v1433_v31  ;;  %v777_v55 = vrot.slane %v761_v48, %v753_v24 }
 0x3a0   :  { %927 = vrot.lane.b32.xlu1 %v884_v40, %s1216_s2  ;;  %v852_v46 = vrot.slane %v784_v41, %v1433_v31  ;;  %v856_v51 = vrot.slane %v792_v47, %v1433_v31  ;;  %v840_v57 = vrot.slane %v812_v53, %v753_v24  ;;  %v794_v61 = vcombine.high %v784_v41, %v784_v41 }
 0x3a1   :  { %v892_v56 = vrot.slane %v843_v52, %v1433_v31  ;;  %v864_v58 = vrot.slane %v777_v55, %v1433_v31  ;;  %v793_v59 = vcombine.high %v777_v55, %v777_v55  ;;  %v763_v62 = vcombine.high %v761_v48, %v761_v48 }
 0x3a2   :  { %909 = vrot.lane.b32.xlu0 %v848_v44, %s1216_s2  ;;  %v900_v60 = vrot.slane %v840_v57, %v1433_v31  ;;  %v842_v0 = vcombine.high %v826_v50, %v826_v50  ;;  %v860_v1 = vrot.slane %v794_v61, %v1433_v31 }
 0x3a3   :  { %v872_v63 = vrot.slane %v793_v59, %v1433_v31  ;;  %v791_v2 = vrot.slane %v763_v62, %v753_v24 }
 0x3a4   :  { %911 = vrot.lane.b32.xlu1 %v852_v46, %s1216_s2  ;;  %v904_v3 = vrot.slane %v842_v0, %v1433_v31 }
 0x3a5   :  { %v868_v4 = vrot.slane %v791_v2, %v1433_v31  ;;  %v795_v5 = vcombine.high %v791_v2, %v791_v2 }
 0x3a6   :  { %929 = vrot.lane.b32.xlu0 %v888_v49, %s1216_s2 }
 0x3a8   :  { %913 = vrot.lane.b32.xlu1 %v856_v51, %s1216_s2 }
 0x3aa   :  { %933 = vrot.lane.b32.xlu0 %v896_v54, %s1216_s2 }
 0x3ac   :  { %931 = vrot.lane.b32.xlu1 %v892_v56, %s1216_s2 }
 0x3ae   :  { %917 = vrot.lane.b32.xlu0 %v864_v58, %s1216_s2 }
 0x3b0   :  { %935 = vrot.lane.b32.xlu1 %v900_v60, %s1216_s2 }
 0x3b2   :  { %921 = vrot.lane.b32.xlu0 %v872_v63, %s1216_s2 }
 0x3b4   :  { %915 = vrot.lane.b32.xlu1 %v860_v1, %s1216_s2 }
 0x3b6   :  { %937 = vrot.lane.b32.xlu0 %v904_v3, %s1216_s2 }
 0x3b8   :  { %919 = vrot.lane.b32.xlu1 %v868_v4, %s1216_s2 }
 0x3b9   :  { %1180 = shalt.err (!%p1177_p4)
}
 0x3ba   :  { %s1218_s25 = smov 128   ;;  %s1219_s26 = smov 8   ;;  %v876_v6 = vrot.slane %v795_v5, %v1433_v31  ;;  %v844_v7 = vcombine.high %v840_v57, %v840_v57  ;;  %v1478_v9 = vpop.f32.mrf.mxu1  ;;  %v1129_v12 = vpop.f32.mrf.mxu0  ;;  %v1034_v14 = vld [vmem:[%s1535_s7 + $0x3] ss:$0 sm:$0xff] }
 0x3bb   :  { %1000 = dma.vmem_to_hbm [thread:$0]  %s995_s6, 256, %s1536_s8, [#allocation3], %s1218_s25, %s1218_s25, %s1219_s26   ;;  %v1484_v17 = vadd.f32 %v1034_v14, %v1428_v26  ;;  %v1487_v19 = vadd.f32 %v1034_v14, %v1431_v30 }
 0x3bc   :  { %923 = vrot.lane.b32.xlu1 %v876_v6, %s1216_s2  ;;  %v908_v8 = vrot.slane %v844_v7, %v1433_v31  ;;  %v680_v10 = vpop.f32.mrf.mxu1  ;;  %v650_v15 = vpop.f32.mrf.mxu0  ;;  %s1220_s7 = smov [#allocation4]  }
 0x3bd   :  { %v729_v28 = vadd.f32 %v650_v15, %v1487_v19  ;;  %v730_v30 = vadd.f32 %v1129_v12, %v1487_v19  ;;  %v735_v55 = vadd.f32 %v680_v10, %v1487_v19  ;;  %v736_v6 = vadd.f32 %v1478_v9, %v1487_v19  ;;  %s1006_s8 = sshll.u32 %s1220_s7, 4  ;;  %s1007_s8 = int_to_ptr.vmem [resolvable:$true] %s1006_s8 }
 0x3be   :  { %v1141_v11 = vpop.f32.mrf.mxu1  ;;  %v1132_v18 = vpop.f32.mrf.mxu0  ;;  %s1189_s10 = scalar_lea.vmem %s1007_s8, 2048  ;;  %p1194_p6 = scmp.lt.s32.totalorder %s1007_s8, %s1007_s8 }
 0x3bf   :  { %v738_v24 = vadd.f32 %v1141_v11, %v1484_v17  ;;  %v732_v61 = vadd.f32 %v1132_v18, %v1487_v19  ;;  %p1190_p5 = scmp.ne.s32.totalorder %s1007_s8, %s1189_s10  ;;  %p1195_p7 = scmp.lt.s32.totalorder %s1189_s10, %s1189_s10 }
 0x3c0   :  { %939 = vrot.lane.b32.xlu1 %v908_v8, %s1216_s2  ;;  %v690_v13 = vpop.f32.mrf.mxu1  ;;  %v660_v25 = vpop.f32.mrf.mxu0 }
 0x3c1   :  { %v737_v20 = vadd.f32 %v690_v13, %v1484_v17  ;;  %v731_v40 = vadd.f32 %v660_v25, %v1487_v19  ;;  %p1196_p8 = por %p1195_p7, %p1194_p6 }
 0x3c2   :  { %v1144_v16 = vpop.f32.mrf.mxu1  ;;  %v1135_v33 = vpop.f32.mrf.mxu0 }
 0x3c3   :  { %v740_v47 = vadd.f32 %v1144_v16, %v1484_v17  ;;  %v734_v3 = vadd.f32 %v1135_v33, %v1487_v19  ;;  %p1197_p9 = pnand %p1196_p8, %p1190_p5 }
 0x3c4   :  { %v700_v21 = vpop.f32.mrf.mxu1  ;;  %v670_v43 = vpop.f32.mrf.mxu0 }
 0x3c5   :  { %v739_v34 = vadd.f32 %v700_v21, %v1484_v17  ;;  %v733_v48 = vadd.f32 %v670_v43, %v1487_v19 }
 0x3c6   :  { %v1147_v29 = vpop.f32.mrf.mxu1 }
 0x3c7   :  { %v742_v54 = vadd.f32 %v1147_v29, %v1484_v17 }
 0x3c8   :  { %v710_v36 = vpop.f32.mrf.mxu1 }
 0x3c9   :  { %v741_v41 = vadd.f32 %v710_v36, %v1484_v17 }
 0x3ca   :  { %v1150_v50 = vpop.f32.mrf.mxu1 }
 0x3cb   :  { %v744_v10 = vadd.f32 %v1150_v50, %v1484_v17 }
 0x3cc   :  { %v720_v57 = vpop.f32.mrf.mxu1 }
 0x3cd   :  { %v743_v62 = vadd.f32 %v720_v57, %v1484_v17 }
 0x410   :  { %v926_v22 = vpop.permute.xlu0 %925 }
 0x411   :  { %v965_v23 = vadd.f32 %v926_v22, %v737_v20 }
 0x412   :  { %v928_v27 = vpop.permute.xlu1 %927 }
 0x413   :  { %981 = vst.msk [vmem:[#allocation4 + $0x40] sm:$0xff] %vm41_vm0, %v965_v23  ;;  %v966_v26 = vadd.f32 %v928_v27, %v738_v24 }
 0x414   :  { %v910_v31 = vpop.permute.xlu0 %909 }
 0x415   :  { %v957_v32 = vadd.f32 %v910_v31, %v729_v28  ;;  %982 = vst.msk [vmem:[#allocation4 + $0x48] sm:$0xff] %vm41_vm0, %v966_v26 }
 0x416   :  { %v912_v35 = vpop.permute.xlu1 %911 }
 0x417   :  { %973 = vst.msk [vmem:[#allocation4] sm:$0xff] %vm41_vm0, %v957_v32  ;;  %v958_v37 = vadd.f32 %v912_v35, %v730_v30 }
 0x418   :  { %v930_v38 = vpop.permute.xlu0 %929 }
 0x419   :  { %v967_v39 = vadd.f32 %v930_v38, %v739_v34  ;;  %974 = vst.msk [vmem:[#allocation4 + $0x8] sm:$0xff] %vm41_vm0, %v958_v37 }
 0x41a   :  { %v914_v42 = vpop.permute.xlu1 %913 }
 0x41b   :  { %983 = vst.msk [vmem:[#allocation4 + $0x50] sm:$0xff] %vm41_vm0, %v967_v39  ;;  %v959_v44 = vadd.f32 %v914_v42, %v731_v40 }
 0x41c   :  { %v934_v45 = vpop.permute.xlu0 %933 }
 0x41d   :  { %v969_v46 = vadd.f32 %v934_v45, %v741_v41  ;;  %975 = vst.msk [vmem:[#allocation4 + $0x10] sm:$0xff] %vm41_vm0, %v959_v44 }
 0x41e   :  { %v932_v49 = vpop.permute.xlu1 %931 }
 0x41f   :  { %985 = vst.msk [vmem:[#allocation4 + $0x60] sm:$0xff] %vm41_vm0, %v969_v46  ;;  %v968_v51 = vadd.f32 %v932_v49, %v740_v47 }
 0x420   :  { %v918_v52 = vpop.permute.xlu0 %917 }
 0x421   :  { %v961_v53 = vadd.f32 %v918_v52, %v733_v48  ;;  %984 = vst.msk [vmem:[#allocation4 + $0x58] sm:$0xff] %vm41_vm0, %v968_v51 }
 0x422   :  { %v936_v56 = vpop.permute.xlu1 %935 }
 0x423   :  { %977 = vst.msk [vmem:[#allocation4 + $0x20] sm:$0xff] %vm41_vm0, %v961_v53  ;;  %v970_v58 = vadd.f32 %v936_v56, %v742_v54 }
 0x424   :  { %v922_v59 = vpop.permute.xlu0 %921 }
 0x425   :  { %v963_v60 = vadd.f32 %v922_v59, %v735_v55  ;;  %986 = vst.msk [vmem:[#allocation4 + $0x68] sm:$0xff] %vm41_vm0, %v970_v58 }
 0x426   :  { %v916_v63 = vpop.permute.xlu1 %915 }
 0x427   :  { %979 = vst.msk [vmem:[#allocation4 + $0x30] sm:$0xff] %vm41_vm0, %v963_v60  ;;  %v960_v0 = vadd.f32 %v916_v63, %v732_v61 }
 0x428   :  { %v938_v1 = vpop.permute.xlu0 %937 }
 0x429   :  { %v971_v2 = vadd.f32 %v938_v1, %v743_v62  ;;  %976 = vst.msk [vmem:[#allocation4 + $0x18] sm:$0xff] %vm41_vm0, %v960_v0 }
 0x42a   :  { %v920_v4 = vpop.permute.xlu1 %919 }
 0x42b   :  { %987 = vst.msk [vmem:[#allocation4 + $0x70] sm:$0xff] %vm41_vm0, %v971_v2  ;;  %v962_v5 = vadd.f32 %v920_v4, %v734_v3 }
 0x42d   :  { %978 = vst.msk [vmem:[#allocation4 + $0x28] sm:$0xff] %vm41_vm0, %v962_v5 }
 0x42e   :  { %v924_v7 = vpop.permute.xlu1 %923 }
 0x42f   :  { %v964_v8 = vadd.f32 %v924_v7, %v736_v6 }
 0x431   :  { %980 = vst.msk [vmem:[#allocation4 + $0x38] sm:$0xff] %vm41_vm0, %v964_v8 }
 0x432   :  { %v940_v11 = vpop.permute.xlu1 %939 }
 0x433   :  { %v972_v12 = vadd.f32 %v940_v11, %v744_v10 }
 0x435   :  { %988 = vst.msk [vmem:[#allocation4 + $0x78] sm:$0xff] %vm41_vm0, %v972_v12 }
 0x436   :  { %1200 = shalt.err (!%p1197_p9)
}
 0x437   :  { %1012 = dma.vmem_to_hbm [thread:$0]  %s1007_s8, 2048, %s1537_s9, [#allocation5], %s1218_s25, %s1218_s25, %s1219_s26  }
 0x438   :  { %1209 = dma.done.wait [#allocation3], 256  }
 0x439   :  { %1210 = vsyncadd [#allocation3], 4294967040 }
 0x43a   :  { %1211 = dma.done.wait [#allocation5], 2048  }
 0x43b   :  { %1212 = vsyncadd [#allocation5], 4294965248 }
 0x43c   :  { %1019 = vsyncpa [#allocation3], 1 }
 0x43d   :  { %1020 = vsyncpa [#allocation5], 1 }

</bundles_post_ra>
